<compile_context>
chip_gen: v7x
topology: tpu7x:2x2x1
jax: 0.10.0
libtpu: 0.0.40
codegen_flags: <defaults>
</compile_context>

<pallas_src>
import functools

import jax
import jax.numpy as jnp
import numpy as np
from jax.experimental import pallas as pl
from jax.experimental.pallas import tpu as pltpu


def _upsample_conv_concat_kernel(x_ref, r_ref, w_ref, b_ref, ew_ref, o_ref, *,
                                 cout, row_tile, w_in, lane_aligned):
    """Fused: y = conv1x1(x); out[:cout] = nearest_x2(y); out[cout:] = r.

    Block shapes (batch dim squeezed by the BlockSpecs; spatial dims pre-flattened):
      x_ref : (C,       TH*W)    input tile, original resolution (rows j*TH .. (j+1)*TH-1)
      r_ref : (Cr,      4*TH*W)  skip-connection tile (already 2x resolution), flat
      w_ref : (Cout,    C)       1x1 conv weight
      b_ref : (Cout,    1)       conv bias
      ew_ref: (W,       2W)      exact one-hot nearest-x2 expansion along W
      o_ref : (Cout+Cr, 4*TH*W)  output tile, flat
    """
    # One MXU pass for the whole tile's 1x1 conv; bias broadcast exactly once per tile.
    acc = jnp.dot(w_ref[...], x_ref[...], preferred_element_type=jnp.float32)
    acc = acc + b_ref[...]                                            # (Cout, TH*W), f32
    ew = ew_ref[...]
    two_w = 2 * w_in

    if lane_aligned:
        # 2W is a multiple of 128: expanded rows are stored directly with aligned, fully
        # dense stores (low register pressure, no large live concatenated value).
        for h in range(row_tile):
            row = acc[:, h * w_in:(h + 1) * w_in]                     # (Cout, W)
            row2 = jnp.dot(row, ew, preferred_element_type=jnp.float32)
            row2 = row2.astype(o_ref.dtype)                           # (Cout, 2W)
            base = 2 * h * two_w                                      # = 4*h*W, 128-aligned
            o_ref[0:cout, base:base + two_w] = row2                   # output row 2h
            o_ref[0:cout, base + two_w:base + 2 * two_w] = row2       # output row 2h+1
    else:
        # Small / unaligned W: assemble the whole upsampled conv tile (small in this regime)
        # and write it with one dense, lane-aligned store.
        pieces = []
        for h in range(row_tile):
            row = acc[:, h * w_in:(h + 1) * w_in]                     # (Cout, W)
            row2 = jnp.dot(row, ew, preferred_element_type=jnp.float32)
            pieces.append(row2)                                       # output row 2h
            pieces.append(row2)                                       # output row 2h+1
        conv_up = jnp.concatenate(pieces, axis=-1)                    # (Cout, 4*TH*W)
        o_ref[0:cout, :] = conv_up.astype(o_ref.dtype)

    # Channel concat: dense, cast-free copy of the skip connection into the tail channels.
    o_ref[cout:, :] = r_ref[...]


def _vmem_capacity_bytes():
    get_info = getattr(pltpu, "get_tpu_info", None)
    if get_info is not None:
        try:
            cap = getattr(get_info(), "vmem_capacity_bytes", None)
            if cap:
                return int(cap)
        except Exception:
            pass
    return 64 * 2**20  # conservative default: v7x per-TensorCore VMEM


def _pick_row_tile(H, W, target_rows, vmem_need, vmem_budget, max_rows=64):
    """Largest divisor of H (<= max_rows) whose flat lane width th*W is 128-aligned and whose
    double-buffered block set fits the VMEM budget; prefers tiles <= target_rows."""
    divisors = sorted((d for d in range(1, H + 1) if H % d == 0 and d <= max_rows),
                      reverse=True)
    aligned = [d for d in divisors if (d * W) % 128 == 0]
    # If W is so odd that no divisor aligns, fall back to padded blocks (never hit below).
    cands = aligned if aligned else divisors
    pref = [d for d in cands if d <= target_rows] or [cands[-1]]
    for th in pref:                       # descending
        if vmem_need(th) <= vmem_budget:
            return th
    return pref[-1]                       # smallest preferred tile; let the compiler cope


def upsampling_forward(x, r, weight, bias, *, row_tile_target=None):
    """Equivalent of UpSampling.forward (PyTorch, NCHW).

    x:      (N, C, H, W)
    r:      (N, Cr, 2H, 2W)
    weight: (Cout, C, 1, 1)   PyTorch Conv2d weight layout (Cout = C // 2 in the module)
    bias:   (Cout,)
    returns (N, Cout + Cr, 2H, 2W)
    """
    N, C, H, W = x.shape
    Cout = weight.shape[0]
    Nr, Cr, H2, W2 = r.shape
    assert Nr == N and H2 == 2 * H and W2 == 2 * W, "skip connection shape mismatch"
    Ctot = Cout + Cr

    out_dtype = x.dtype
    itemsize = jnp.dtype(out_dtype).itemsize
    r = r.astype(out_dtype)  # keeps the in-kernel r copy cast-free

    # --- generation-aware VMEM budget & row tile ---------------------------------------
    vmem_budget = int(0.75 * _vmem_capacity_bytes())   # ~48 MiB on v7x, ~96 MiB on v5e/v6e

    def vmem_need(th):
        k = th * W
        blocks = itemsize * (C * k + Cr * 4 * k + Ctot * 4 * k)   # one buffer of each block
        params = itemsize * Cout * C + 4 * (2 * W * W + Cout)     # weight + f32 ew + bias
        live = 4 * (Cout * k + Cout * 4 * k + 4 * Cout * W)       # acc + assembled conv tile
        return 2 * blocks + params + live + (2 << 20)             # double-buffer + headroom

    if row_tile_target is None:
        # Bigger row tiles when W is small so the flat lane width stays >= ~1024.
        row_tile_target = max(8, min(64, 1024 // max(W, 1)))
    th = _pick_row_tile(H, W, row_tile_target, vmem_need, vmem_budget)
    grid = (N, H // th)
    k = th * W
    lane_aligned = (2 * W) % 128 == 0

    # --- operands -----------------------------------------------------------------------
    # Free (metadata-only) reshapes: flattened spatial dims keep every block lane-dense
    # (a multiple of 128 lanes) regardless of W.
    x_flat = x.reshape(N, C, H * W)
    r_flat = r.reshape(N, Cr, 4 * H * W)
    w_mat = weight.reshape(Cout, C).astype(out_dtype)
    b_col = bias.reshape(Cout, 1).astype(jnp.float32)
    # Exact one-hot nearest-x2 expansion along W: ew[w, 2w] = ew[w, 2w+1] = 1 (kept in f32
    # so the expansion is exact for both f32 and bf16 inputs).
    ew = (jnp.arange(2 * W)[None, :] // 2 == jnp.arange(W)[:, None]).astype(jnp.float32)

    vmem_limit = int(min(vmem_budget, max(16 * 2**20, vmem_need(th))))

    cost = pl.CostEstimate(
        flops=2 * N * H * W * C * Cout            # 1x1 conv at original resolution
        + 4 * N * H * Cout * W * W,               # one-hot W-expansion matmuls
        transcendentals=0,
        bytes_accessed=itemsize * (x.size + r.size + N * Ctot * 4 * H * W + w_mat.size)
        + 4 * (ew.size + Cout),
    )

    kernel = functools.partial(_upsample_conv_concat_kernel, cout=Cout, row_tile=th,
                               w_in=W, lane_aligned=lane_aligned)

    out_flat = pl.pallas_call(
        kernel,
        out_shape=jax.ShapeDtypeStruct((N, Ctot, 4 * H * W), out_dtype),
        grid_spec=pltpu.PrefetchScalarGridSpec(
            num_scalar_prefetch=0,
            grid=grid,
            in_specs=[
                pl.BlockSpec((None, C, k), lambda n, j: (n, 0, j)),
                pl.BlockSpec((None, Cr, 4 * k), lambda n, j: (n, 0, j)),
                pl.BlockSpec((Cout, C), lambda n, j: (0, 0)),
                pl.BlockSpec((Cout, 1), lambda n, j: (0, 0)),
                pl.BlockSpec((W, 2 * W), lambda n, j: (0, 0)),
            ],
            out_specs=pl.BlockSpec((None, Ctot, 4 * k), lambda n, j: (n, 0, j)),
        ),
        compiler_params=pltpu.CompilerParams(
            dimension_semantics=("parallel", "parallel"),
            vmem_limit_bytes=vmem_limit,
        ),
        cost_estimate=cost,
    )(x_flat, r_flat, w_mat, b_col, ew)

    return out_flat.reshape(N, Ctot, 2 * H, 2 * W)


def _reference(x, r, weight, bias):
    """Pure-JAX reference: conv AFTER upsample, exactly as the PyTorch module does."""
    Cout = weight.shape[0]
    up = jnp.repeat(jnp.repeat(x, 2, axis=2), 2, axis=3)
    conv = jnp.einsum("nchw,oc->nohw", up, weight.reshape(Cout, -1)) \
        + bias.reshape(1, Cout, 1, 1)
    return jnp.concatenate((conv, r), axis=1)


if __name__ == "__main__":
    key = jax.random.PRNGKey(0)

    def make_case(case_key, N, C, H, W):
        k_x, k_r, k_w, k_b = jax.random.split(case_key, 4)
        Cout = C // 2
        x = jax.random.normal(k_x, (N, C, H, W), dtype=jnp.float32)
        r = jax.random.normal(k_r, (N, Cout, 2 * H, 2 * W), dtype=jnp.float32)
        weight = jax.random.normal(k_w, (Cout, C, 1, 1), dtype=jnp.float32) * 0.1
        bias = jax.random.normal(k_b, (Cout,), dtype=jnp.float32) * 0.1
        return x, r, weight, bias

    keys = jax.random.split(key, 2)

    # Case 1: the module's nominal small shape, auto tiling.
    x, r, w, b = make_case(keys[0], N=2, C=4, H=16, W=16)
    out = jax.block_until_ready(upsampling_forward(x, r, w, b))
    assert out.shape == (2, 4, 32, 32)
    np.testing.assert_allclose(np.asarray(out), np.asarray(_reference(x, r, w, b)),
                               rtol=1e-5, atol=1e-5)

    # Case 2: same inputs with a smaller row-tile target so the H-tiling index maps of the
    # pipelined grid (grid = (N, 2)) are exercised as well.
    out = jax.block_until_ready(upsampling_forward(x, r, w, b, row_tile_target=8))
    np.testing.assert_allclose(np.asarray(out), np.asarray(_reference(x, r, w, b)),
                               rtol=1e-5, atol=1e-5)

    # Case 3: lane-aligned width (2W = 128) exercising the direct aligned-store path.
    x3, r3, w3, b3 = make_case(keys[1], N=1, C=8, H=8, W=64)
    out3 = jax.block_until_ready(upsampling_forward(x3, r3, w3, b3))
    np.testing.assert_allclose(np.asarray(out3), np.asarray(_reference(x3, r3, w3, b3)),
                               rtol=1e-5, atol=1e-5)

    print("KERNEL_OK")
</pallas_src>

<mosaic_0001>
module attributes {stable_mosaic.version = 11 : i64} {
  func.func @_upsample_conv_concat_kernel(%arg0: i32, %arg1: i32, %arg2: memref<1x4x256xf32, #tpu.memory_space<vmem>>, %arg3: memref<1x2x1024xf32, #tpu.memory_space<vmem>>, %arg4: memref<2x4xf32, #tpu.memory_space<vmem>>, %arg5: memref<2x1xf32, #tpu.memory_space<vmem>>, %arg6: memref<16x32xf32, #tpu.memory_space<vmem>>, %arg7: memref<1x4x1024xf32, #tpu.memory_space<vmem>>) attributes {dimension_semantics = [#tpu.dimension_semantics<parallel>, #tpu.dimension_semantics<parallel>], iteration_bounds = array<i64: 2, 1>, scalar_prefetch = 0 : i64, scratch_operands = 0 : i64, tpu.core_type = #tpu.core_type<tc>, window_params = [{transform_indices = @transform_0, window_bounds = array<i64: 1, 4, 256>}, {transform_indices = @transform_1, window_bounds = array<i64: 1, 2, 1024>}, {pipeline_mode = #tpu.pipeline_mode<synchronous>, transform_indices = @transform_2, window_bounds = array<i64: 2, 4>}, {pipeline_mode = #tpu.pipeline_mode<synchronous>, transform_indices = @transform_3, window_bounds = array<i64: 2, 1>}, {pipeline_mode = #tpu.pipeline_mode<synchronous>, transform_indices = @transform_4, window_bounds = array<i64: 16, 32>}, {transform_indices = @transform_5, window_bounds = array<i64: 1, 4, 1024>}]} {
    %c0 = arith.constant 0 : index
    %c0_0 = arith.constant 0 : index
    %0 = vector.load %arg4[%c0, %c0_0] : memref<2x4xf32, #tpu.memory_space<vmem>>, vector<2x4xf32>
    %c0_1 = arith.constant 0 : index
    %c0_2 = arith.constant 0 : index
    %c0_3 = arith.constant 0 : index
    %1 = vector.load %arg2[%c0_1, %c0_2, %c0_3] : memref<1x4x256xf32, #tpu.memory_space<vmem>>, vector<1x4x256xf32>
    %2 = vector.shape_cast %1 : vector<1x4x256xf32> to vector<4x256xf32>
    %cst = arith.constant dense<0.000000e+00> : vector<2x256xf32>
    %3 = tpu.matmul %0, %2, %cst {dimension_numbers = #tpu.dot_dimension_numbers<[1], [0], [0], [1], [0, 0, 1, 1], [], []>} : vector<2x4xf32>, vector<4x256xf32>, vector<2x256xf32> -> vector<2x256xf32>
    %c0_4 = arith.constant 0 : index
    %c0_5 = arith.constant 0 : index
    %4 = vector.load %arg5[%c0_4, %c0_5] : memref<2x1xf32, #tpu.memory_space<vmem>>, vector<2x1xf32>
    %5 = vector.broadcast %4 : vector<2x1xf32> to vector<2x256xf32>
    %6 = arith.addf %3, %5 : vector<2x256xf32>
    %c0_6 = arith.constant 0 : index
    %c0_7 = arith.constant 0 : index
    %7 = vector.load %arg6[%c0_6, %c0_7] : memref<16x32xf32, #tpu.memory_space<vmem>>, vector<16x32xf32>
    %8 = vector.extract_strided_slice %6 {offsets = [0, 0], sizes = [2, 16], strides = [1, 1]} : vector<2x256xf32> to vector<2x16xf32>
    %cst_8 = arith.constant dense<0.000000e+00> : vector<2x32xf32>
    %9 = tpu.matmul %8, %7, %cst_8 {dimension_numbers = #tpu.dot_dimension_numbers<[1], [0], [0], [1], [0, 0, 1, 1], [], []>} : vector<2x16xf32>, vector<16x32xf32>, vector<2x32xf32> -> vector<2x32xf32>
    %10 = vector.extract_strided_slice %6 {offsets = [0, 16], sizes = [2, 16], strides = [1, 1]} : vector<2x256xf32> to vector<2x16xf32>
    %cst_9 = arith.constant dense<0.000000e+00> : vector<2x32xf32>
    %11 = tpu.matmul %10, %7, %cst_9 {dimension_numbers = #tpu.dot_dimension_numbers<[1], [0], [0], [1], [0, 0, 1, 1], [], []>} : vector<2x16xf32>, vector<16x32xf32>, vector<2x32xf32> -> vector<2x32xf32>
    %12 = vector.extract_strided_slice %6 {offsets = [0, 32], sizes = [2, 16], strides = [1, 1]} : vector<2x256xf32> to vector<2x16xf32>
    %cst_10 = arith.constant dense<0.000000e+00> : vector<2x32xf32>
    %13 = tpu.matmul %12, %7, %cst_10 {dimension_numbers = #tpu.dot_dimension_numbers<[1], [0], [0], [1], [0, 0, 1, 1], [], []>} : vector<2x16xf32>, vector<16x32xf32>, vector<2x32xf32> -> vector<2x32xf32>
    %14 = vector.extract_strided_slice %6 {offsets = [0, 48], sizes = [2, 16], strides = [1, 1]} : vector<2x256xf32> to vector<2x16xf32>
    %cst_11 = arith.constant dense<0.000000e+00> : vector<2x32xf32>
    %15 = tpu.matmul %14, %7, %cst_11 {dimension_numbers = #tpu.dot_dimension_numbers<[1], [0], [0], [1], [0, 0, 1, 1], [], []>} : vector<2x16xf32>, vector<16x32xf32>, vector<2x32xf32> -> vector<2x32xf32>
    %16 = vector.extract_strided_slice %6 {offsets = [0, 64], sizes = [2, 16], strides = [1, 1]} : vector<2x256xf32> to vector<2x16xf32>
    %cst_12 = arith.constant dense<0.000000e+00> : vector<2x32xf32>
    %17 = tpu.matmul %16, %7, %cst_12 {dimension_numbers = #tpu.dot_dimension_numbers<[1], [0], [0], [1], [0, 0, 1, 1], [], []>} : vector<2x16xf32>, vector<16x32xf32>, vector<2x32xf32> -> vector<2x32xf32>
    %18 = vector.extract_strided_slice %6 {offsets = [0, 80], sizes = [2, 16], strides = [1, 1]} : vector<2x256xf32> to vector<2x16xf32>
    %cst_13 = arith.constant dense<0.000000e+00> : vector<2x32xf32>
    %19 = tpu.matmul %18, %7, %cst_13 {dimension_numbers = #tpu.dot_dimension_numbers<[1], [0], [0], [1], [0, 0, 1, 1], [], []>} : vector<2x16xf32>, vector<16x32xf32>, vector<2x32xf32> -> vector<2x32xf32>
    %20 = vector.extract_strided_slice %6 {offsets = [0, 96], sizes = [2, 16], strides = [1, 1]} : vector<2x256xf32> to vector<2x16xf32>
    %cst_14 = arith.constant dense<0.000000e+00> : vector<2x32xf32>
    %21 = tpu.matmul %20, %7, %cst_14 {dimension_numbers = #tpu.dot_dimension_numbers<[1], [0], [0], [1], [0, 0, 1, 1], [], []>} : vector<2x16xf32>, vector<16x32xf32>, vector<2x32xf32> -> vector<2x32xf32>
    %22 = vector.extract_strided_slice %6 {offsets = [0, 112], sizes = [2, 16], strides = [1, 1]} : vector<2x256xf32> to vector<2x16xf32>
    %cst_15 = arith.constant dense<0.000000e+00> : vector<2x32xf32>
    %23 = tpu.matmul %22, %7, %cst_15 {dimension_numbers = #tpu.dot_dimension_numbers<[1], [0], [0], [1], [0, 0, 1, 1], [], []>} : vector<2x16xf32>, vector<16x32xf32>, vector<2x32xf32> -> vector<2x32xf32>
    %24 = vector.extract_strided_slice %6 {offsets = [0, 128], sizes = [2, 16], strides = [1, 1]} : vector<2x256xf32> to vector<2x16xf32>
    %cst_16 = arith.constant dense<0.000000e+00> : vector<2x32xf32>
    %25 = tpu.matmul %24, %7, %cst_16 {dimension_numbers = #tpu.dot_dimension_numbers<[1], [0], [0], [1], [0, 0, 1, 1], [], []>} : vector<2x16xf32>, vector<16x32xf32>, vector<2x32xf32> -> vector<2x32xf32>
    %26 = vector.extract_strided_slice %6 {offsets = [0, 144], sizes = [2, 16], strides = [1, 1]} : vector<2x256xf32> to vector<2x16xf32>
    %cst_17 = arith.constant dense<0.000000e+00> : vector<2x32xf32>
    %27 = tpu.matmul %26, %7, %cst_17 {dimension_numbers = #tpu.dot_dimension_numbers<[1], [0], [0], [1], [0, 0, 1, 1], [], []>} : vector<2x16xf32>, vector<16x32xf32>, vector<2x32xf32> -> vector<2x32xf32>
    %28 = vector.extract_strided_slice %6 {offsets = [0, 160], sizes = [2, 16], strides = [1, 1]} : vector<2x256xf32> to vector<2x16xf32>
    %cst_18 = arith.constant dense<0.000000e+00> : vector<2x32xf32>
    %29 = tpu.matmul %28, %7, %cst_18 {dimension_numbers = #tpu.dot_dimension_numbers<[1], [0], [0], [1], [0, 0, 1, 1], [], []>} : vector<2x16xf32>, vector<16x32xf32>, vector<2x32xf32> -> vector<2x32xf32>
    %30 = vector.extract_strided_slice %6 {offsets = [0, 176], sizes = [2, 16], strides = [1, 1]} : vector<2x256xf32> to vector<2x16xf32>
    %cst_19 = arith.constant dense<0.000000e+00> : vector<2x32xf32>
    %31 = tpu.matmul %30, %7, %cst_19 {dimension_numbers = #tpu.dot_dimension_numbers<[1], [0], [0], [1], [0, 0, 1, 1], [], []>} : vector<2x16xf32>, vector<16x32xf32>, vector<2x32xf32> -> vector<2x32xf32>
    %32 = vector.extract_strided_slice %6 {offsets = [0, 192], sizes = [2, 16], strides = [1, 1]} : vector<2x256xf32> to vector<2x16xf32>
    %cst_20 = arith.constant dense<0.000000e+00> : vector<2x32xf32>
    %33 = tpu.matmul %32, %7, %cst_20 {dimension_numbers = #tpu.dot_dimension_numbers<[1], [0], [0], [1], [0, 0, 1, 1], [], []>} : vector<2x16xf32>, vector<16x32xf32>, vector<2x32xf32> -> vector<2x32xf32>
    %34 = vector.extract_strided_slice %6 {offsets = [0, 208], sizes = [2, 16], strides = [1, 1]} : vector<2x256xf32> to vector<2x16xf32>
    %cst_21 = arith.constant dense<0.000000e+00> : vector<2x32xf32>
    %35 = tpu.matmul %34, %7, %cst_21 {dimension_numbers = #tpu.dot_dimension_numbers<[1], [0], [0], [1], [0, 0, 1, 1], [], []>} : vector<2x16xf32>, vector<16x32xf32>, vector<2x32xf32> -> vector<2x32xf32>
    %36 = vector.extract_strided_slice %6 {offsets = [0, 224], sizes = [2, 16], strides = [1, 1]} : vector<2x256xf32> to vector<2x16xf32>
    %cst_22 = arith.constant dense<0.000000e+00> : vector<2x32xf32>
    %37 = tpu.matmul %36, %7, %cst_22 {dimension_numbers = #tpu.dot_dimension_numbers<[1], [0], [0], [1], [0, 0, 1, 1], [], []>} : vector<2x16xf32>, vector<16x32xf32>, vector<2x32xf32> -> vector<2x32xf32>
    %38 = vector.extract_strided_slice %6 {offsets = [0, 240], sizes = [2, 16], strides = [1, 1]} : vector<2x256xf32> to vector<2x16xf32>
    %cst_23 = arith.constant dense<0.000000e+00> : vector<2x32xf32>
    %39 = tpu.matmul %38, %7, %cst_23 {dimension_numbers = #tpu.dot_dimension_numbers<[1], [0], [0], [1], [0, 0, 1, 1], [], []>} : vector<2x16xf32>, vector<16x32xf32>, vector<2x32xf32> -> vector<2x32xf32>
    %40 = tpu.concatenate %9, %9, %11, %11, %13, %13, %15, %15, %17, %17, %19, %19, %21, %21, %23, %23 in 1 : vector<2x32xf32>, vector<2x32xf32>, vector<2x32xf32>, vector<2x32xf32>, vector<2x32xf32>, vector<2x32xf32>, vector<2x32xf32>, vector<2x32xf32>, vector<2x32xf32>, vector<2x32xf32>, vector<2x32xf32>, vector<2x32xf32>, vector<2x32xf32>, vector<2x32xf32>, vector<2x32xf32>, vector<2x32xf32> -> vector<2x512xf32>
    %41 = tpu.concatenate %25, %25, %27, %27, %29, %29, %31, %31, %33, %33, %35, %35, %37, %37, %39, %39 in 1 : vector<2x32xf32>, vector<2x32xf32>, vector<2x32xf32>, vector<2x32xf32>, vector<2x32xf32>, vector<2x32xf32>, vector<2x32xf32>, vector<2x32xf32>, vector<2x32xf32>, vector<2x32xf32>, vector<2x32xf32>, vector<2x32xf32>, vector<2x32xf32>, vector<2x32xf32>, vector<2x32xf32>, vector<2x32xf32> -> vector<2x512xf32>
    %42 = tpu.concatenate %40, %41 in 1 : vector<2x512xf32>, vector<2x512xf32> -> vector<2x1024xf32>
    %c0_24 = arith.constant 0 : index
    %c0_25 = arith.constant 0 : index
    %c0_26 = arith.constant 0 : index
    %43 = vector.load %arg7[%c0_24, %c0_25, %c0_26] : memref<1x4x1024xf32, #tpu.memory_space<vmem>>, vector<1x2x1024xf32>
    %44 = vector.shape_cast %43 : vector<1x2x1024xf32> to vector<2x1024xf32>
    %45 = vector.shape_cast %42 : vector<2x1024xf32> to vector<1x2x1024xf32>
    tpu.vector_store %arg7[%c0_24, %c0_25, %c0_26], %45 {strides = array<i32>} : memref<1x4x1024xf32, #tpu.memory_space<vmem>>, vector<1x2x1024xf32>,
    %c0_27 = arith.constant 0 : index
    %c0_28 = arith.constant 0 : index
    %c0_29 = arith.constant 0 : index
    %46 = vector.load %arg3[%c0_27, %c0_28, %c0_29] : memref<1x2x1024xf32, #tpu.memory_space<vmem>>, vector<1x2x1024xf32>
    %47 = vector.shape_cast %46 : vector<1x2x1024xf32> to vector<2x1024xf32>
    %c0_30 = arith.constant 0 : index
    %c2 = arith.constant 2 : index
    %c0_31 = arith.constant 0 : index
    %48 = vector.load %arg7[%c0_30, %c2, %c0_31] : memref<1x4x1024xf32, #tpu.memory_space<vmem>>, vector<1x2x1024xf32>
    %49 = vector.shape_cast %48 : vector<1x2x1024xf32> to vector<2x1024xf32>
    %50 = vector.shape_cast %47 : vector<2x1024xf32> to vector<1x2x1024xf32>
    tpu.vector_store %arg7[%c0_30, %c2, %c0_31], %50 {strides = array<i32>} : memref<1x4x1024xf32, #tpu.memory_space<vmem>>, vector<1x2x1024xf32>,
    return
  }
  func.func @transform_0(%arg0: i32, %arg1: i32) -> (i32, i32, i32) {
    %c0_i32 = arith.constant 0 : i32
    %c0_i32_0 = arith.constant 0 : i32
    return %arg0, %c0_i32, %arg1 : i32, i32, i32
  }
  func.func @transform_1(%arg0: i32, %arg1: i32) -> (i32, i32, i32) {
    %c0_i32 = arith.constant 0 : i32
    %c0_i32_0 = arith.constant 0 : i32
    return %arg0, %c0_i32, %arg1 : i32, i32, i32
  }
  func.func @transform_2(%arg0: i32, %arg1: i32) -> (i32, i32) {
    %c0_i32 = arith.constant 0 : i32
    %c0_i32_0 = arith.constant 0 : i32
    %c0_i32_1 = arith.constant 0 : i32
    return %c0_i32, %c0_i32_0 : i32, i32
  }
  func.func @transform_3(%arg0: i32, %arg1: i32) -> (i32, i32) {
    %c0_i32 = arith.constant 0 : i32
    %c0_i32_0 = arith.constant 0 : i32
    %c0_i32_1 = arith.constant 0 : i32
    return %c0_i32, %c0_i32_0 : i32, i32
  }
  func.func @transform_4(%arg0: i32, %arg1: i32) -> (i32, i32) {
    %c0_i32 = arith.constant 0 : i32
    %c0_i32_0 = arith.constant 0 : i32
    %c0_i32_1 = arith.constant 0 : i32
    return %c0_i32, %c0_i32_0 : i32, i32
  }
  func.func @transform_5(%arg0: i32, %arg1: i32) -> (i32, i32, i32) {
    %c0_i32 = arith.constant 0 : i32
    %c0_i32_0 = arith.constant 0 : i32
    return %arg0, %c0_i32, %arg1 : i32, i32, i32
  }
}

</mosaic_0001>

<bundles_post_ra>
// kernel: tpu_custom_call.1
= control target key start
LH: loop header
LB: loop body
LE: loop exit
PB: predicated region body
PF: predicated region fallthrough
CT: control target
= control target key end

     0   :  { %10 = vsyncpa [#allocation3], 0  ;;  %s2822_s0 = inlined_call_operand.hbm [shape: f32[2,4,256], index: 0, kind: input, shape index: {}]   ;;  %s2823_s1 = inlined_call_operand.hbm [shape: f32[2,2,1024], index: 1, kind: input, shape index: {}]   ;;  %s2824_s2 = inlined_call_operand.vmem [shape: f32[2,4], index: 2, kind: input, shape index: {}]   ;;  %s2825_s3 = inlined_call_operand.vmem [shape: f32[2,1], index: 3, kind: input, shape index: {}]   ;;  %s2826_s4 = inlined_call_operand.vmem [shape: f32[16,32], index: 4, kind: input, shape index: {}]   ;;  %s2827_s5 = inlined_call_operand.hbm [shape: f32[2,4,1024], index: 5, kind: output, shape index: {}]  }
   0x1   :  { %12 = vsyncpa [#allocation3 + $0x1], 0 }
   0x2   :  { %13 = vsyncpa [#allocation6], 0 }
   0x3   :  { %15 = vsyncpa [#allocation6 + $0x1], 0 }
   0x4   :  { %16 = vsyncpa [#allocation4], 0 }
   0x5   :  { %18 = vsyncpa [#allocation4 + $0x1], 0  ;;  %s2410_s18 = smov 0   ;;  %s2412_s19 = smov 0  }
   0x6   :  { %s2414_s20 = smov 0   ;;  %s2416_s21 = smov 0  }
   0x7   :  { %s2418_s22 = smov 0   ;;  %s2420_s23 = smov 0  }
   0x8 LB: > { %s1883_s24 = sadd.s32 4294967295, %s2364_s23   ;;  %s1884_s25 = sadd.s32 4294967294, %s2364_s23   ;;  %s2364_s23 = sphi %s2420_s23, %s24_s23   ;;  %s2360_s22 = sphi %s2418_s22, %s2847_s22   ;;  %s2356_s21 = sphi %s2416_s21, %s2846_s21   ;;  %s2352_s20 = sphi %s2414_s20, %s2845_s20   ;;  %s2348_s19 = sphi %s2412_s19, %s2844_s19   ;;  %s2344_s18 = sphi %s2410_s18, %s2843_s18  }
   0x9   : > { %s36_s26 = sadd.s32 1, %s2360_s22  ;;  %s45_s27 = sadd.s32 1, %s2352_s20 }
   0xa   : > { %p38_p0 = scmp.ge.s32.totalorder %s36_s26, 2  ;;  %p52_p1 = scmp.ne.s32.totalorder %s2352_s20, %s2348_s19 }
   0xb   : > { %p53_p2 = scmp.eq.s32.totalorder %s2364_s23, 0  ;;  %p58_p3 = scmp.ne.s32.totalorder %s2348_s19, %s2344_s18 }
   0xc   : > { %s2849_s26 = smov (%p38_p0, %s36_s26), 0  ;;  %p59_p5 = scmp.eq.s32.totalorder %s1883_s24, 0 }
   0xd   : > { %p2451_p4 = por %p53_p2, %p52_p1  ;;  %s40_s29 = ssub.s32 %s2360_s22, %s2849_s26 }
   0xe   : > { %p175_p6 = scmp.eq.s32.totalorder %s1883_s24, 1  ;;  %p43_p7 = scmp.eq.s32.totalorder %s40_s29, 0 }
   0xf   : > { %p2457_p8 = por %p59_p5, %p58_p3  ;;  %p181_p10 = scmp.eq.s32.totalorder %s1884_s25, 1 }
  0x10   : > { %p2461_p9 = por %p175_p6, %p52_p1  ;;  %p2153_p13 = scmp.lt.s32.totalorder %s2364_s23, 2 }
  0x11   : > { %s2831_s30 = scalar_select %p2457_p8, 1, 0 }
  0x12   : > { %s2832_s6 = scalar_select %p2461_p9, 1, 0 }
  0x13   : > { %s2466_s7 = scalar_select %p43_p7, %s2352_s20, %s45_s27  }
  0x14   : > { %p2468_p11 = por %p181_p10, %p58_p3  ;;  %s2475_s9 = sand.u32 1, %s2352_s20  }
  0x15   : > { %s1887_s10 = sshll.u32 %s2475_s9, 3  ;;  %s1925_s11 = sshll.u32 %s2360_s22, 7 }
  0x16   : > { %s2833_s8 = scalar_select %p2468_p11, 1, 0 }
  0x17   : > { %s2482_s14 = scalar_lea.hbm %s2822_s0, %s1925_s11  ;;  %s214_s15 = scalar_lea.vmem [#allocation2], %s1887_s10 }
  0x18   : > { %s224_s16 = sshll.u32 %s214_s15, 4  ;;  %p2488_p0 = pnand %p2153_p13, %p2451_p4  ;;  %s2484_s16 = int_to_ptr.vmem [resolvable:$true] %s224_s16 }
  0x19   : > { %s211_s24 = scalar_lea.sflag [#allocation3], %s2475_s9  ;;  %s2218_s25 = scalar_lea.hbm %s2482_s14, 128 }
  0x1a   : > { %p2219_p3 = scmp.ne.s32.totalorder %s2482_s14, %s2218_s25  ;;  %p2220_p5 = pneg %p2488_p0 }
  0x1b   : > { %s2223_s28 = scalar_lea.hbm %s2822_s0, 256  ;;  %p2224_p4 = scmp.lt.u32.totalorder %s2482_s14, %s2822_s0 }
  0x1c   : > { %p2221_p6 = pnand %p2220_p5, %p2219_p3  ;;  %p2225_p10 = scmp.lt.u32.totalorder %s2223_s28, %s2218_s25 }
  0x1d   : > { %p2227_p12 = scmp.lt.u32.totalorder %s2218_s25, %s2482_s14 }
  0x1e   : > { %p2222_p7 = pneg %p2221_p6  ;;  %p2226_p13 = por %p2225_p10, %p2224_p4 }
  0x20   : > { %p2228_p1 = por %p2227_p12, %p2226_p13 }
  0x22   : > { %p2229_p2 = pnand %p2228_p1, %p2222_p7 }
  0x24   : > { %2232 = shalt.err (!%p2229_p2)
}
  0x25   : > { %s2233_s12 = scalar_lea.vmem %s2484_s16, 128  ;;  %s2366_s13 = smov [#allocation2]  }
  0x26   : > { %p2234_p3 = scmp.ne.s32.totalorder %s2484_s16, %s2233_s12  ;;  %s2238_s15 = sshll.u32 %s2366_s13, 4  ;;  %s2239_s15 = int_to_ptr.vmem [resolvable:$false] %s2238_s15 }
  0x27   : > { %s2240_s27 = scalar_lea.vmem %s2239_s15, 256  ;;  %p2241_p9 = scmp.lt.s32.totalorder %s2484_s16, %s2239_s15 }
  0x28   : > { %p2236_p6 = pnand %p2234_p3, %p2220_p5  ;;  %p2242_p4 = scmp.lt.s32.totalorder %s2240_s27, %s2233_s12 }
  0x2a   : > { %p2237_p11 = pneg %p2236_p6  ;;  %p2243_p10 = por %p2242_p4, %p2241_p9 }
  0x2c   : > { %p2244_p12 = pnand %p2243_p10, %p2237_p11 }
  0x2e   : > { %2247 = shalt.err (!%p2244_p12)
}
  0x2f   : > { %2145 = dma.hbm_to_vmem [thread:$0]  (!%p2488_p0), %s2482_s14, 128, %s2484_s16, %s211_s24  }
  0x30   : > { %p2835_p1 = scmp.lt.s32.totalorder %s2364_s23, 3  ;;  %p2836_p2 = scmp.ge.s32.totalorder %s2364_s23, 1 }
  0x31   : > { %s1890_s29 = sshll.u32 %s2475_s9, 4  ;;  %s1926_s28 = sshll.u32 %s2360_s22, 8 }
  0x32   : > { %p2524_p7 = pnand %p2836_p2, %p2835_p1  ;;  %s2533_s12 = scalar_lea.hbm %s2823_s1, %s1926_s28 }
  0x33   : > { %s235_s13 = scalar_lea.vmem [#allocation5], %s1890_s29  ;;  %s232_s14 = scalar_lea.sflag [#allocation6], %s2475_s9 }
  0x34   : > { %s2837_s25 = scalar_select %p2524_p7, 1, 0 }
  0x35   : > { %s245_s15 = sshll.u32 %s235_s13, 4  ;;  %s2248_s16 = scalar_lea.hbm %s2533_s12, 256  ;;  %s246_s15 = int_to_ptr.vmem [resolvable:$true] %s245_s15 }
  0x36   : > { %p2249_p9 = scmp.ne.s32.totalorder %s2533_s12, %s2248_s16  ;;  %s2253_s10 = scalar_lea.hbm %s2823_s1, 512 }
  0x37   : > { %p2254_p3 = scmp.lt.u32.totalorder %s2533_s12, %s2823_s1  ;;  %p2255_p6 = scmp.lt.u32.totalorder %s2253_s10, %s2248_s16 }
  0x38   : > { %p2251_p11 = pnand %p2249_p9, %p2220_p5  ;;  %p2257_p10 = scmp.lt.u32.totalorder %s2248_s16, %s2533_s12 }
  0x39   : > { %p2256_p4 = por %p2255_p6, %p2254_p3 }
  0x3a   : > { %p2252_p13 = pneg %p2251_p11 }
  0x3b   : > { %p2258_p12 = por %p2257_p10, %p2256_p4 }
  0x3d   : > { %p2259_p1 = pnand %p2258_p12, %p2252_p13 }
  0x3f   : > { %2262 = shalt.err (!%p2259_p1)
}
  0x40   : > { %s2263_s9 = scalar_lea.vmem %s246_s15, 256  ;;  %s2367_s29 = smov [#allocation5]  }
  0x41   : > { %p2264_p2 = scmp.ne.s32.totalorder %s246_s15, %s2263_s9  ;;  %s2268_s13 = sshll.u32 %s2367_s29, 4  ;;  %s2269_s13 = int_to_ptr.vmem [resolvable:$false] %s2268_s13 }
  0x42   : > { %s2270_s24 = scalar_lea.vmem %s2269_s13, 512  ;;  %p2271_p8 = scmp.lt.s32.totalorder %s246_s15, %s2269_s13 }
  0x43   : > { %p2266_p9 = pnand %p2264_p2, %p2220_p5  ;;  %p2272_p7 = scmp.lt.s32.totalorder %s2270_s24, %s2263_s9 }
  0x45   : > { %p2267_p11 = pneg %p2266_p9  ;;  %p2273_p3 = por %p2272_p7, %p2271_p8 }
  0x47   : > { %p2274_p6 = pnand %p2273_p3, %p2267_p11 }
  0x49   : > { %2277 = shalt.err (!%p2274_p6)
}
  0x4a   : > { %2148 = dma.hbm_to_vmem [thread:$0]  (!%p2488_p0), %s2533_s12, 256, %s246_s15, %s232_s14  }
  0x4b   : > { %p2838_p13 = scmp.ne.s32.totalorder %s2837_s25, 0 }
  0x4c   : > { %s2558_s16 = sand.u32 (!%p2838_p13), 1, %s2348_s19   ;;  %p2839_p5 = scmp.ne.s32.totalorder (!%p2838_p13), %s2831_s30, 0 }
  0x4d   : > { %254 = sbr.rel (%p2838_p13) target bundleno = 810 (0x32a), region = 40  ;;  %s1894_s27 = sshll.u32 (!%p2838_p13), %s2558_s16, 3 }
  0x4e   : > { %s257_s10 = scalar_lea.sflag (!%p2838_p13), [#allocation3], %s2558_s16  ;;  %s260_s28 = scalar_lea.vmem (!%p2838_p13), [#allocation2], %s1894_s27 }
  0x54   : > { %2331 = dma.done.wait (%p2839_p5), %s257_s10, 128  }
  0x55   : > { %2333 = vsyncadd (%p2839_p5), %s257_s10, 4294967168  ;;  %s1895_s17 = sshll.u32 %s2558_s16, 4  ;;  %s266_s25 = scalar_lea.sflag [#allocation6], %s2558_s16 }
  0x56   : > { %s2568_s12 = scalar_lea.vmem [#allocation5], %s1895_s17 }
  0x57   : > { %2335 = dma.done.wait (%p2839_p5), %s266_s25, 256  }
  0x58   : > { %2337 = vsyncadd (%p2839_p5), %s266_s25, 4294967040  ;;  %v2368_v0 = vmov 0.0   ;;  %v2369_v1 = vmov 0   ;;  %v2370_v2 = vmov 0.0|0.0   ;;  %v305_v3 = vld [vmem:[%s260_s28] sm:$0xff]  ;;  %vm318_vm0 = vcmask 1043456  }
  0x59   : > { %387 = vmatprep.mubr.f32.mxu0 %v2368_v0  ;;  %2214 = vset.pattern.permute.xlu0 %v2369_v1  ;;  %v306_v4 = vld [vmem:[%s2825_s3] sm:$0x3]  ;;  %v313_v5 = vcombine.high %v305_v3, %v305_v3  ;;  %v395_v7 = vld [vmem:[%s2826_s4 + $0x8] sm:$0xff]  ;;  %vm314_vm1 = vcmask 31744   ;;  %vm2371_vm2 = vmmov 0   ;;  %vm396_vm3 = vcmask 130048  }
  0x5a   : > { %2088 = vmatprep.subr.bf16.mxu1 %v2370_v2  ;;  %309 = vperm.xlu0 %2214, %v306_v4   ;;  %v394_v6 = vld [vmem:[%s2826_s4] sm:$0xff]  ;;  %s2372_s27 = smov 96   ;;  %s2373_s10 = smov 112   ;;  %v1715_v62 = vld [vmem:[%s2568_s12 + $0x8] sm:$0xff]  ;;  %vm1623_vm4 = vcmask 261120   ;;  %vm1625_vm5 = vcmask 523264  }
  0x5b   : > { %v304_v8 = vld [vmem:[%s2824_s2] sm:$0x3]  ;;  %v2588_v9 = vpack.c.bf16 %v395_v7, %v394_v6  ;;  %1897 = vmatprep.subr.msk.mxu0 %vm318_vm0, %v313_v5  ;;  %1980 = vmatprep.mubr.msk.f32.mxu1 %vm2371_vm2, %v2368_v0  ;;  %s2374_s28 = smov 80   ;;  %s2375_s17 = smov 64   ;;  %vm1627_vm6 = vcmask 785408  }
  0x5c   : > { %1898 = vmatpush1.msk.msra.mxu0 %vm318_vm0, %v305_v3  ;;  %s2376_s25 = smov 48   ;;  %s2377_s15 = smov 32   ;;  %v1714_v61 = vld [vmem:[%s2568_s12] sm:$0xff] }
  0x5d   : > { %2090 = vmatpush3.bf16.msra.mxu1 %v2588_v9  ;;  %1899 = vmatmul.mubr.msk.f32.vlgmr.msra.gmra.mrb[0].mxu0 %vm314_vm1, %v304_v8  ;;  %s2378_s14 = smov 16   ;;  %s1896_s11 = sshll.u32 %s2558_s16, 5  ;;  %v1718_v63 = vcombine.low %v1714_v61, %v1714_v61 }
  0x5e   : > { %2091 = vmatprep.subr.bf16.mxu0 %v2370_v2  ;;  %2094 = vmatprep.subr.bf16.mxu1 %v2370_v2  ;;  %s2720_s9 = scalar_lea.vmem [#allocation7], %s1896_s11  ;;  %s1927_s12 = sshll.u32 %s2356_s21, 9 }
  0x5f   : > { %2093 = vmatpush3.bf16.msra.mxu0 %v2588_v9  ;;  %1987 = vmatprep.mubr.msk.f32.mxu0 %vm2371_vm2, %v2368_v0  ;;  %1917 = vst.sshfl [vmem:[%s2720_s9 + $0x8] sm:$0xf0 pattern:$0x76325410] %v1714_v61  ;;  %s1773_s30 = sshll.u32 %s2720_s9, 4  ;;  %s2772_s24 = scalar_lea.hbm %s2827_s5, %s1927_s12  ;;  %s2774_s30 = int_to_ptr.vmem [resolvable:$true] %s1773_s30 }
  0x60   : > { %2097 = vmatprep.subr.bf16.mxu0 %v2370_v2  ;;  %1919 = vst.sshfl [vmem:[%s2720_s9 + $0x18] sm:$0xf0 pattern:$0x76325410] %v1715_v62  ;;  %s1757_s21 = scalar_lea.sflag [#allocation4], %s2558_s16  ;;  %p2840_p0 = scmp.ne.s32.totalorder %s2832_s6, 0 }
  0x61   : > { %1916 = vst.sshfl [vmem:[%s2720_s9] sm:$0xf0 pattern:$0x76325410] %v1718_v63 }
  0xd9   : > { %v310_v10 = vpop.permute.xlu0 %309 }
 0x130   : > { %v389_v11 = vpop.f32.mrb[0].mxu0 }
 0x131   : > { %v390_v12 = vadd.f32 %v389_v11, %v310_v10  ;;  %v391_v13 = vpop.f32.mrb[1].mxu0 }
 0x132   : > { %v392_v14 = vadd.f32 %v391_v13, %v310_v10 }
 0x133   : > { %544 = vrot.lane.b32.xlu1 %v390_v12, %s2372_s27  ;;  %470 = vrot.lane.b32.xlu0 %v390_v12, %s2373_s10 }
 0x134   : > { %1981 = vmatmul.mubr.msk.f32.vlgmr.msra.gmra.mrb[0].mxu1 %vm396_vm3, %v390_v12 }
 0x135   : > { %2096 = vmatpush3.bf16.msra.mxu1 %v2588_v9  ;;  %1994 = vmatprep.mubr.msk.f32.mxu1 %vm2371_vm2, %v2368_v0 }
 0x136   : > { %2100 = vmatprep.subr.bf16.mxu1 %v2370_v2 }
 0x137   : > { %618 = vrot.lane.b32.xlu1 %v390_v12, %s2374_s28  ;;  %692 = vrot.lane.b32.xlu0 %v390_v12, %s2375_s17 }
 0x13b   : > { %766 = vrot.lane.b32.xlu1 %v390_v12, %s2376_s25  ;;  %840 = vrot.lane.b32.xlu0 %v390_v12, %s2377_s15 }
 0x13f   : > { %914 = vrot.lane.b32.xlu1 %v390_v12, %s2378_s14  ;;  %1061 = vrot.lane.b32.xlu0 %v392_v14, %s2373_s10  ;;  %s2379_s10 = smov [#allocation7]  }
 0x143   : > { %1135 = vrot.lane.b32.xlu1 %v392_v14, %s2372_s27  ;;  %1209 = vrot.lane.b32.xlu0 %v392_v14, %s2374_s28  ;;  %s2282_s28 = sshll.u32 %s2379_s10, 4  ;;  %s2283_s28 = int_to_ptr.vmem [resolvable:$false] %s2282_s28 }
 0x144   : > { %p2285_p10 = scmp.lt.s32.totalorder %s2774_s30, %s2283_s28 }
 0x147   : > { %1283 = vrot.lane.b32.xlu1 %v392_v14, %s2375_s17  ;;  %1357 = vrot.lane.b32.xlu0 %v392_v14, %s2376_s25 }
 0x14b   : > { %1431 = vrot.lane.b32.xlu1 %v392_v14, %s2377_s15  ;;  %1505 = vrot.lane.b32.xlu0 %v392_v14, %s2378_s14 }
 0x1a5   : > { %v545_v15 = vpop.permute.xlu1 %544  ;;  %v471_v16 = vpop.permute.xlu0 %470 }
 0x1a6   : > { %1988 = vmatmul.mubr.msk.f32.vlgmr.msra.gmra.mrb[2].mxu0 %vm396_vm3, %v471_v16  ;;  %1995 = vmatmul.mubr.msk.f32.vlgmr.msra.gmra.mrb[2].mxu1 %vm396_vm3, %v545_v15 }
 0x1a7   : > { %2099 = vmatpush3.bf16.msra.mxu0 %v2588_v9  ;;  %2102 = vmatpush3.bf16.msra.mxu1 %v2588_v9 }
 0x1a8   : > { %2001 = vmatprep.mubr.msk.f32.mxu0 %vm2371_vm2, %v2368_v0  ;;  %2008 = vmatprep.mubr.msk.f32.mxu1 %vm2371_vm2, %v2368_v0 }
 0x1a9   : > { %v619_v17 = vpop.permute.xlu1 %618  ;;  %v693_v18 = vpop.permute.xlu0 %692  ;;  %2103 = vmatprep.subr.bf16.mxu0 %v2370_v2  ;;  %2106 = vmatprep.subr.bf16.mxu1 %v2370_v2 }
 0x1aa   : > { %2002 = vmatmul.mubr.msk.f32.vlgmr.msra.gmra.mrb[4].mxu0 %vm396_vm3, %v619_v17  ;;  %2009 = vmatmul.mubr.msk.f32.vlgmr.msra.gmra.mrb[4].mxu1 %vm396_vm3, %v693_v18 }
 0x1ab   : > { %2105 = vmatpush3.bf16.msra.mxu0 %v2588_v9  ;;  %2108 = vmatpush3.bf16.msra.mxu1 %v2588_v9 }
 0x1ac   : > { %2015 = vmatprep.mubr.msk.f32.mxu0 %vm2371_vm2, %v2368_v0  ;;  %2022 = vmatprep.mubr.msk.f32.mxu1 %vm2371_vm2, %v2368_v0 }
 0x1ad   : > { %v767_v19 = vpop.permute.xlu1 %766  ;;  %v841_v20 = vpop.permute.xlu0 %840  ;;  %2109 = vmatprep.subr.bf16.mxu0 %v2370_v2  ;;  %2112 = vmatprep.subr.bf16.mxu1 %v2370_v2 }
 0x1ae   : > { %2016 = vmatmul.mubr.msk.f32.vlgmr.msra.gmra.mrb[6].mxu0 %vm396_vm3, %v767_v19  ;;  %2023 = vmatmul.mubr.msk.f32.vlgmr.msra.gmra.mrb[6].mxu1 %vm396_vm3, %v841_v20 }
 0x1af   : > { %2111 = vmatpush3.bf16.msra.mxu0 %v2588_v9  ;;  %2114 = vmatpush3.bf16.msra.mxu1 %v2588_v9 }
 0x1b0   : > { %2029 = vmatprep.mubr.msk.f32.mxu0 %vm2371_vm2, %v2368_v0  ;;  %2036 = vmatprep.mubr.msk.f32.mxu1 %vm2371_vm2, %v2368_v0 }
 0x1b1   : > { %v915_v21 = vpop.permute.xlu1 %914  ;;  %v1062_v22 = vpop.permute.xlu0 %1061  ;;  %2115 = vmatprep.subr.bf16.mxu0 %v2370_v2  ;;  %2118 = vmatprep.subr.bf16.mxu1 %v2370_v2 }
 0x1b2   : > { %2030 = vmatmul.mubr.msk.f32.vlgmr.msra.gmra.mrb[8].mxu0 %vm396_vm3, %v915_v21  ;;  %2037 = vmatmul.mubr.msk.f32.vlgmr.msra.gmra.mrb[8].mxu1 %vm396_vm3, %v392_v14 }
 0x1b3   : > { %2117 = vmatpush3.bf16.msra.mxu0 %v2588_v9  ;;  %2120 = vmatpush3.bf16.msra.mxu1 %v2588_v9 }
 0x1b4   : > { %2043 = vmatprep.mubr.msk.f32.mxu0 %vm2371_vm2, %v2368_v0  ;;  %2050 = vmatprep.mubr.msk.f32.mxu1 %vm2371_vm2, %v2368_v0 }
 0x1b5   : > { %v1136_v23 = vpop.permute.xlu1 %1135  ;;  %v1210_v24 = vpop.permute.xlu0 %1209  ;;  %2121 = vmatprep.subr.bf16.mxu0 %v2370_v2  ;;  %2124 = vmatprep.subr.bf16.mxu1 %v2370_v2 }
 0x1b6   : > { %2044 = vmatmul.mubr.msk.f32.vlgmr.msra.gmra.mrb[10].mxu0 %vm396_vm3, %v1062_v22  ;;  %2051 = vmatmul.mubr.msk.f32.vlgmr.msra.gmra.mrb[10].mxu1 %vm396_vm3, %v1136_v23 }
 0x1b7   : > { %2123 = vmatpush3.bf16.msra.mxu0 %v2588_v9  ;;  %2126 = vmatpush3.bf16.msra.mxu1 %v2588_v9 }
 0x1b8   : > { %2057 = vmatprep.mubr.msk.f32.mxu0 %vm2371_vm2, %v2368_v0  ;;  %2064 = vmatprep.mubr.msk.f32.mxu1 %vm2371_vm2, %v2368_v0 }
 0x1b9   : > { %v1284_v25 = vpop.permute.xlu1 %1283  ;;  %2127 = vmatprep.subr.bf16.mxu0 %v2370_v2  ;;  %2130 = vmatprep.subr.bf16.mxu1 %v2370_v2  ;;  %v1358_v26 = vpop.permute.xlu0 %1357 }
 0x1ba   : > { %2058 = vmatmul.mubr.msk.f32.vlgmr.msra.gmra.mrb[12].mxu0 %vm396_vm3, %v1210_v24  ;;  %2065 = vmatmul.mubr.msk.f32.vlgmr.msra.gmra.mrb[12].mxu1 %vm396_vm3, %v1284_v25 }
 0x1bb   : > { %2129 = vmatpush3.bf16.msra.mxu0 %v2588_v9  ;;  %2132 = vmatpush3.bf16.msra.mxu1 %v2588_v9 }
 0x1bc   : > { %2071 = vmatprep.mubr.msk.f32.mxu0 %vm2371_vm2, %v2368_v0  ;;  %2078 = vmatprep.mubr.msk.f32.mxu1 %vm2371_vm2, %v2368_v0 }
 0x1bd   : > { %v1432_v27 = vpop.permute.xlu1 %1431  ;;  %2133 = vmatprep.subr.bf16.mxu0 %v2370_v2  ;;  %v1506_v28 = vpop.permute.xlu0 %1505 }
 0x1be   : > { %2072 = vmatmul.mubr.msk.f32.vlgmr.msra.gmra.mrb[14].mxu0 %vm396_vm3, %v1358_v26  ;;  %2079 = vmatmul.mubr.msk.f32.vlgmr.msra.gmra.mrb[14].mxu1 %vm396_vm3, %v1432_v27 }
 0x1bf   : > { %2135 = vmatpush3.bf16.msra.mxu0 %v2588_v9  ;;  %2085 = vmatprep.mubr.msk.f32.mxu0 %vm2371_vm2, %v2368_v0  ;;  %v1733_v0 = vcombine.low %v1715_v62, %v1715_v62 }
 0x1c1   : > { %1918 = vst.sshfl [vmem:[%s2720_s9 + $0x10] sm:$0xf0 pattern:$0x76325410] %v1733_v0 }
 0x1c2   : > { %2086 = vmatmul.mubr.msk.f32.vlgmr.msra.gmra.mrb[16].mxu0 %vm396_vm3, %v1506_v28 }
 0x207   : > { %v2675_v29 = vpop.f32.mrb[0].mxu1 }
 0x208   : > { %1580 = vrot.lane.b32.xlu1 %v2675_v29, %s2377_s15  ;;  %v1982_v30 = vpop.f32.mrb[1].mxu1 }
 0x279   : > { %v540_v31 = vpop.f32.mrb[2].mxu0  ;;  %v2679_v32 = vpop.f32.mrb[2].mxu1 }
 0x27a   : > { %v1989_v33 = vpop.f32.mrb[3].mxu0  ;;  %1584 = vrot.lane.b32.xlu1 %v540_v31, %s2375_s17  ;;  %1591 = vrot.lane.b32.xlu0 %v2679_v32, %s2377_s15  ;;  %v1996_v34 = vpop.f32.mrb[3].mxu1 }
 0x27b   : > { %v1581_v1 = vpop.permute.xlu1 %1580 }
 0x27c   : > { %v1624_v6 = vsel %vm1623_vm4, %v2675_v29, %v1581_v1 }
 0x27d   : > { %v688_v35 = vpop.f32.mrb[4].mxu0  ;;  %v2684_v36 = vpop.f32.mrb[4].mxu1 }
 0x27e   : > { %v2003_v37 = vpop.f32.mrb[5].mxu0  ;;  %1587 = vrot.lane.b32.xlu1 %v540_v31, %s2372_s27  ;;  %1595 = vrot.lane.b32.xlu0 %v688_v35, %s2375_s17  ;;  %v2010_v38 = vpop.f32.mrb[5].mxu1 }
 0x281   : > { %v836_v39 = vpop.f32.mrb[6].mxu0  ;;  %v2688_v40 = vpop.f32.mrb[6].mxu1 }
 0x282   : > { %v2017_v41 = vpop.f32.mrb[7].mxu0  ;;  %1598 = vrot.lane.b32.xlu0 %v688_v35, %s2372_s27  ;;  %1602 = vrot.lane.b32.xlu1 %v2684_v36, %s2377_s15  ;;  %v2024_v42 = vpop.f32.mrb[7].mxu1 }
 0x285   : > { %v984_v43 = vpop.f32.mrb[8].mxu0  ;;  %v2693_v44 = vpop.f32.mrb[8].mxu1 }
 0x286   : > { %v2031_v45 = vpop.f32.mrb[9].mxu0  ;;  %1606 = vrot.lane.b32.xlu1 %v836_v39, %s2375_s17  ;;  %1613 = vrot.lane.b32.xlu0 %v2688_v40, %s2377_s15  ;;  %v2038_v46 = vpop.f32.mrb[9].mxu1 }
 0x289   : > { %v1131_v47 = vpop.f32.mrb[10].mxu0  ;;  %v2698_v48 = vpop.f32.mrb[10].mxu1 }
 0x28a   : > { %v2045_v49 = vpop.f32.mrb[11].mxu0  ;;  %1609 = vrot.lane.b32.xlu1 %v836_v39, %s2372_s27  ;;  %1617 = vrot.lane.b32.xlu0 %v984_v43, %s2375_s17  ;;  %v2052_v50 = vpop.f32.mrb[11].mxu1 }
 0x28d   : > { %v1279_v51 = vpop.f32.mrb[12].mxu0  ;;  %v2702_v52 = vpop.f32.mrb[12].mxu1 }
 0x28e   : > { %v2059_v53 = vpop.f32.mrb[13].mxu0  ;;  %1620 = vrot.lane.b32.xlu0 %v984_v43, %s2372_s27  ;;  %1639 = vrot.lane.b32.xlu1 %v2693_v44, %s2377_s15  ;;  %v2066_v54 = vpop.f32.mrb[13].mxu1 }
 0x291   : > { %v1427_v55 = vpop.f32.mrb[14].mxu0  ;;  %v2707_v56 = vpop.f32.mrb[14].mxu1 }
 0x292   : > { %v2073_v57 = vpop.f32.mrb[15].mxu0  ;;  %1643 = vrot.lane.b32.xlu1 %v1131_v47, %s2375_s17  ;;  %1650 = vrot.lane.b32.xlu0 %v2698_v48, %s2377_s15  ;;  %v2080_v58 = vpop.f32.mrb[15].mxu1 }
 0x295   : > { %v1575_v59 = vpop.f32.mrb[16].mxu0 }
 0x296   : > { %v2087_v60 = vpop.f32.mrb[17].mxu0  ;;  %1646 = vrot.lane.b32.xlu1 %v1131_v47, %s2372_s27  ;;  %1654 = vrot.lane.b32.xlu0 %v1279_v51, %s2375_s17 }
 0x29a   : > { %1657 = vrot.lane.b32.xlu0 %v1279_v51, %s2372_s27  ;;  %1661 = vrot.lane.b32.xlu1 %v2702_v52, %s2377_s15 }
 0x29e   : > { %1665 = vrot.lane.b32.xlu1 %v1427_v55, %s2375_s17  ;;  %1672 = vrot.lane.b32.xlu0 %v2707_v56, %s2377_s15 }
 0x2a2   : > { %1668 = vrot.lane.b32.xlu1 %v1427_v55, %s2372_s27  ;;  %1676 = vrot.lane.b32.xlu0 %v1575_v59, %s2375_s17  ;;  %s2284_s17 = scalar_lea.vmem %s2283_s28, 1024 }
 0x2a6   : > { %1679 = vrot.lane.b32.xlu0 %v1575_v59, %s2372_s27  ;;  %s2278_s27 = scalar_lea.vmem %s2774_s30, 512 }
 0x2a7   : > { %p2279_p8 = scmp.ne.s32.totalorder %s2774_s30, %s2278_s27  ;;  %p2286_p12 = scmp.lt.s32.totalorder %s2284_s17, %s2278_s27 }
 0x2a9   : > { %p2280_p7 = pnand %p2279_p8, %p2840_p0  ;;  %p2287_p1 = por %p2286_p12, %p2285_p10 }
 0x2ab   : > { %p2281_p4 = pneg %p2280_p7 }
 0x2ad   : > { %p2288_p2 = pnand %p2287_p1, %p2281_p4 }
 0x2ec   : > { %v1585_v2 = vpop.permute.xlu1 %1584  ;;  %v1592_v3 = vpop.permute.xlu0 %1591 }
 0x2ed   : > { %v1629_v7 = vsel %vm1623_vm4, %v2679_v32, %v1592_v3  ;;  %v1626_v8 = vsel %vm1625_vm5, %v1624_v6, %v1585_v2 }
 0x2f0   : > { %v1588_v4 = vpop.permute.xlu1 %1587  ;;  %v1596_v5 = vpop.permute.xlu0 %1595 }
 0x2f1   : > { %v1630_v9 = vsel %vm1625_vm5, %v1629_v7, %v1596_v5  ;;  %v1628_v12 = vsel %vm1627_vm6, %v1626_v8, %v1588_v4 }
 0x2f4   : > { %v1599_v10 = vpop.permute.xlu0 %1598  ;;  %v1603_v11 = vpop.permute.xlu1 %1602 }
 0x2f5   : > { %v1631_v13 = vsel %vm1627_vm6, %v1630_v9, %v1599_v10  ;;  %v1632_v19 = vsel %vm1623_vm4, %v2684_v36, %v1603_v11 }
 0x2f6   : > { %v1702_v14 = vcombine.low %v1628_v12, %v1631_v13 }
 0x2f8   : > { %1710 = vst [vmem:[%s2720_s9] sm:$0x33] %v1702_v14  ;;  %v1607_v15 = vpop.permute.xlu1 %1606  ;;  %v1614_v16 = vpop.permute.xlu0 %1613 }
 0x2f9   : > { %v1635_v20 = vsel %vm1623_vm4, %v2688_v40, %v1614_v16  ;;  %v1633_v21 = vsel %vm1625_vm5, %v1632_v19, %v1607_v15 }
 0x2fc   : > { %v1610_v17 = vpop.permute.xlu1 %1609  ;;  %v1618_v18 = vpop.permute.xlu0 %1617 }
 0x2fd   : > { %v1636_v22 = vsel %vm1625_vm5, %v1635_v20, %v1618_v18  ;;  %v1634_v25 = vsel %vm1627_vm6, %v1633_v21, %v1610_v17 }
 0x300   : > { %v1621_v23 = vpop.permute.xlu0 %1620  ;;  %v1640_v24 = vpop.permute.xlu1 %1639 }
 0x301   : > { %v1637_v26 = vsel %vm1627_vm6, %v1636_v22, %v1621_v23  ;;  %v1682_v32 = vsel %vm1623_vm4, %v2693_v44, %v1640_v24 }
 0x302   : > { %v1703_v27 = vcombine.low %v1634_v25, %v1637_v26 }
 0x304   : > { %1711 = vst [vmem:[%s2720_s9 + $0x8] sm:$0x33] %v1703_v27  ;;  %v1644_v28 = vpop.permute.xlu1 %1643  ;;  %v1651_v29 = vpop.permute.xlu0 %1650 }
 0x305   : > { %v1685_v33 = vsel %vm1623_vm4, %v2698_v48, %v1651_v29  ;;  %v1683_v34 = vsel %vm1625_vm5, %v1682_v32, %v1644_v28 }
 0x308   : > { %v1647_v30 = vpop.permute.xlu1 %1646  ;;  %v1655_v31 = vpop.permute.xlu0 %1654 }
 0x309   : > { %v1686_v35 = vsel %vm1625_vm5, %v1685_v33, %v1655_v31  ;;  %v1684_v38 = vsel %vm1627_vm6, %v1683_v34, %v1647_v30 }
 0x30c   : > { %v1658_v36 = vpop.permute.xlu0 %1657  ;;  %v1662_v37 = vpop.permute.xlu1 %1661 }
 0x30d   : > { %v1687_v39 = vsel %vm1627_vm6, %v1686_v35, %v1658_v36  ;;  %v1688_v45 = vsel %vm1623_vm4, %v2702_v52, %v1662_v37 }
 0x30e   : > { %v1704_v40 = vcombine.low %v1684_v38, %v1687_v39 }
 0x310   : > { %1712 = vst [vmem:[%s2720_s9 + $0x10] sm:$0x33] %v1704_v40  ;;  %v1666_v41 = vpop.permute.xlu1 %1665  ;;  %v1673_v42 = vpop.permute.xlu0 %1672 }
 0x311   : > { %v1691_v46 = vsel %vm1623_vm4, %v2707_v56, %v1673_v42  ;;  %v1689_v47 = vsel %vm1625_vm5, %v1688_v45, %v1666_v41 }
 0x314   : > { %v1677_v43 = vpop.permute.xlu0 %1676  ;;  %v1669_v44 = vpop.permute.xlu1 %1668 }
 0x315   : > { %v1692_v48 = vsel %vm1625_vm5, %v1691_v46, %v1677_v43  ;;  %v1690_v50 = vsel %vm1627_vm6, %v1689_v47, %v1669_v44 }
 0x318   : > { %v1680_v49 = vpop.permute.xlu0 %1679 }
 0x319   : > { %v1693_v51 = vsel %vm1627_vm6, %v1692_v48, %v1680_v49 }
 0x31a   : > { %v1705_v53 = vcombine.low %v1690_v50, %v1693_v51 }
 0x31c   : > { %1713 = vst [vmem:[%s2720_s9 + $0x18] sm:$0x33] %v1705_v53 }
 0x31d   : > { %2291 = shalt.err (!%p2288_p2)
}
 0x31e   : > { %s2292_s16 = scalar_lea.hbm %s2772_s24, 512  ;;  %s2296_s14 = scalar_lea.hbm %s2827_s5, 1024 }
 0x31f   : > { %p2293_p9 = scmp.ne.s32.totalorder %s2772_s24, %s2292_s16  ;;  %p2297_p6 = scmp.lt.u32.totalorder %s2772_s24, %s2827_s5 }
 0x320   : > { %p2298_p13 = scmp.lt.u32.totalorder %s2296_s14, %s2292_s16  ;;  %p2300_p8 = scmp.lt.u32.totalorder %s2292_s16, %s2772_s24 }
 0x321   : > { %p2294_p11 = pnand %p2293_p9, %p2840_p0 }
 0x322   : > { %p2299_p5 = por %p2298_p13, %p2297_p6 }
 0x323   : > { %p2295_p3 = pneg %p2294_p11 }
 0x324   : > { %p2301_p7 = por %p2300_p8, %p2299_p5 }
 0x326   : > { %p2302_p4 = pnand %p2301_p7, %p2295_p3 }
 0x328   : > { %2305 = shalt.err (!%p2302_p4)
}
 0x329   : > { %2140 = dma.vmem_to_hbm [thread:$0]  (%p2840_p0), %s2774_s30, 512, %s2772_s24, %s1757_s21  }
 0x32a PF: > { %s1785_s12 = sand.u32 1, %s2344_s18   ;;  %p2841_p10 = scmp.ne.s32.totalorder %s2833_s8, 0 }
 0x32b   : > { %p2842_p12 = scmp.ge.s32.totalorder %s2364_s23, 2  ;;  %s1786_s29 = scalar_lea.sflag [#allocation4], %s1785_s12 }
 0x32d   : > { %p2150_p1 = pnand %p2842_p12, %p2841_p10 }
 0x32f   : > { %2339 = dma.done.wait (!%p2150_p1), %s1786_s29, 512  }
 0x330   : > { %2341 = vsyncadd (!%p2150_p1), %s1786_s29, 4294966784  ;;  %s24_s23 = sadd.s32 1, %s2364_s23   ;;  %s2843_s18 = smov %s2348_s19 }
 0x331   : > { %p21_p2 = scmp.ge.s32.totalorder %s24_s23, 4   ;;  %s2844_s19 = smov %s2352_s20 }
 0x332   : > { %s2845_s20 = smov %s2466_s7  ;;  %s2846_s21 = smov %s2360_s22 }
 0x333   : > { %s2847_s22 = smov %s2849_s26  ;;  %23 = sbr.rel (!%p21_p2) target bundleno = 8 (0x8), region = 98 }
 0x33a   :  { %1791 = vsyncpa [#allocation3], 1 }
 0x33b   :  { %1793 = vsyncpa [#allocation3 + $0x1], 1 }
 0x33c   :  { %1794 = vsyncpa [#allocation6], 1 }
 0x33d   :  { %1796 = vsyncpa [#allocation6 + $0x1], 1 }
 0x33e   :  { %1797 = vsyncpa [#allocation4], 1 }
 0x33f   :  { %1799 = vsyncpa [#allocation4 + $0x1], 1 }

</bundles_post_ra>
